<compile_context>
chip_gen: v6e
topology: v6e:2x2x1
jax: 0.10.0
libtpu: 0.0.40
codegen_flags: <defaults>
</compile_context>

<pallas_src>
import math

import jax
import jax.numpy as jnp
from jax.experimental import pallas as pl
from jax.experimental.pallas import tpu as pltpu


def _rope_kernel(x_ref, cos_ref, sin_ref, o_ref):
    x = x_ref[...].astype(jnp.float32)   # (1, TS, F)
    c = cos_ref[...]                     # (1, TS, F) f32: [c0, c0, c1, c1, ...] per head
    s = sin_ref[...]                     # (1, TS, F) f32: [-s0, s0, -s1, s1, ...] per head

    n = x.shape[-1]
    # Swap adjacent lane pairs: (2i, 2i+1) -> (2i+1, 2i) using XLU lane rotates
    # (free slot in this mem-bound kernel) + a parity select on the VPU.
    nxt = pltpu.roll(x, shift=n - 1, axis=2)   # nxt[..., j] = x[..., (j + 1) % n]
    prv = pltpu.roll(x, shift=1, axis=2)       # prv[..., j] = x[..., (j - 1) % n]
    lane = jax.lax.broadcasted_iota(jnp.int32, x.shape, dimension=2)
    x_swap = jnp.where(lane % 2 == 0, nxt, prv)

    o_ref[...] = (x * c + x_swap * s).astype(o_ref.dtype)


def _choose_seq_tile(seq_rows: int, feat: int, itemsize: int,
                     target_bytes: int = 2 << 20) -> int:
    """Largest seq tile (multiple of 8, dividing seq_rows) near ~2 MiB per block."""
    target_rows = max(8, target_bytes // max(1, feat * itemsize))
    if seq_rows <= target_rows:
        return seq_rows
    ts = (min(seq_rows, target_rows) // 8) * 8
    while ts >= 8:
        if seq_rows % ts == 0:
            return ts
        ts -= 8
    return seq_rows


@jax.jit
def rotary_positional_embedding(x):
    """Pallas implementation of RotaryPositionalEmbedding.forward.

    Accepts x of shape (B, S, H, D) (the layout the module's (1, S, 1, D/2)
    cos/sin views broadcast against) or (B, S, D) (treated as H = 1). RoPE is
    applied over even/odd pairs of the last dim; the angle depends on position.
    """
    orig_shape = x.shape
    if x.ndim == 4:
        B, S, H, D = x.shape
    elif x.ndim == 3:
        B, S, D = x.shape
        H = 1
    else:
        raise ValueError(f"Expected 3D or 4D input, got shape {orig_shape}")
    if D % 2 != 0:
        raise ValueError("RoPE requires an even feature dim")

    F = H * D

    # --- f32 cos/sin tables (equivalent to the module's registered buffers),
    # pre-expanded to the flattened (H*D) lane layout with the sin sign folded.
    inv_freq = 1.0 / (10000.0 ** (jnp.arange(0, D, 2, dtype=jnp.float32) / D))
    ang = jnp.arange(S, dtype=jnp.float32)[:, None] * inv_freq[None, :]   # (S, D/2)
    cos = jnp.cos(ang)
    sin = jnp.sin(ang)
    cos_full = jnp.repeat(cos, 2, axis=-1)                                # (S, D)
    sin_sgn = jnp.stack([-sin, sin], axis=-1).reshape(S, D)               # (S, D)
    cos_t = jnp.tile(cos_full, (1, H))                                    # (S, F)
    sin_t = jnp.tile(sin_sgn, (1, H))                                     # (S, F)

    # --- Lane-density guard: fold g positions into the lane axis so the last
    # dim is a multiple of 128 (unmasked vst). Pairs never straddle a position
    # boundary since F is even, so the in-kernel swap is unchanged.
    g = 1
    if F % 128 != 0:
        need = 128 // math.gcd(F, 128)
        if S % need == 0:
            g = need
    S_rows = S // g
    Ff = F * g

    x2 = x.reshape(B, S_rows, Ff)
    cos_t = cos_t.reshape(1, S_rows, Ff)
    sin_t = sin_t.reshape(1, S_rows, Ff)

    itemsize = jnp.dtype(x.dtype).itemsize
    TS = _choose_seq_tile(S_rows, Ff, max(itemsize, 4))

    # Batch innermost: table block index is constant across the inner loop, so
    # Pallas skips re-fetching cos/sin for every batch element.
    grid = (S_rows // TS, B)

    # VMEM budget: (x + out) in x.dtype + (cos + sin) in f32, double-buffered.
    block_bytes = TS * Ff * (2 * itemsize + 2 * 4)
    vmem_limit = int(min(48 << 20, max(32 << 20, 3 * block_bytes)))

    out = pl.pallas_call(
        _rope_kernel,
        out_shape=jax.ShapeDtypeStruct((B, S_rows, Ff), x.dtype),
        grid=grid,
        in_specs=[
            pl.BlockSpec((1, TS, Ff), lambda si, b: (b, si, 0)),   # x
            pl.BlockSpec((1, TS, Ff), lambda si, b: (0, si, 0)),   # cos (b-invariant)
            pl.BlockSpec((1, TS, Ff), lambda si, b: (0, si, 0)),   # sin (b-invariant)
        ],
        out_specs=pl.BlockSpec((1, TS, Ff), lambda si, b: (b, si, 0)),
        compiler_params=pltpu.CompilerParams(
            dimension_semantics=("parallel", "parallel"),
            vmem_limit_bytes=vmem_limit,
        ),
    )(x2, cos_t, sin_t)

    return out.reshape(orig_shape)


def _rope_ref(x):
    """Pure-JAX reference mirroring the PyTorch forward (f32 tables)."""
    S_ = x.shape[1]
    D_ = x.shape[-1]
    inv_freq = 1.0 / (10000.0 ** (jnp.arange(0, D_, 2, dtype=jnp.float32) / D_))
    ang = jnp.arange(S_, dtype=jnp.float32)[:, None] * inv_freq[None, :]   # (S, D/2)
    bshape = [1] * x.ndim
    bshape[1] = S_
    bshape[-1] = D_ // 2
    cos_b = jnp.cos(ang).reshape(bshape)
    sin_b = jnp.sin(ang).reshape(bshape)
    x1, x2 = x[..., 0::2], x[..., 1::2]
    out = jnp.stack([x1 * cos_b - x2 * sin_b, x1 * sin_b + x2 * cos_b], axis=-1)
    return out.reshape(x.shape).astype(x.dtype)


if __name__ == "__main__":
    key = jax.random.PRNGKey(0)

    # 4D (B, S, H, D): the layout the module's (1, S, 1, D/2) views broadcast against.
    B, S, H, D = 2, 8, 4, 64
    x4 = jax.random.normal(key, (B, S, H, D), dtype=jnp.float32)
    y4 = jax.block_until_ready(rotary_positional_embedding(x4))
    ok = bool(jnp.allclose(y4, _rope_ref(x4), rtol=1e-5, atol=1e-5))

    # 3D (B, S, D) with D = 64 exercises the lane-folding path (H*D not % 128).
    x3 = jax.random.normal(jax.random.PRNGKey(0), (1, 8, 64), dtype=jnp.float32)
    y3 = jax.block_until_ready(rotary_positional_embedding(x3))
    ok = ok and bool(jnp.allclose(y3, _rope_ref(x3), rtol=1e-5, atol=1e-5))

    print("KERNEL_OK" if ok else "KERNEL_MISMATCH")
</pallas_src>

<mosaic_0001>
module attributes {stable_mosaic.version = 11 : i64} {
  func.func @_rope_kernel(%arg0: i32, %arg1: i32, %arg2: memref<1x8x256xf32, #tpu.memory_space<vmem>>, %arg3: memref<1x8x256xf32, #tpu.memory_space<vmem>>, %arg4: memref<1x8x256xf32, #tpu.memory_space<vmem>>, %arg5: memref<1x8x256xf32, #tpu.memory_space<vmem>>) attributes {dimension_semantics = [#tpu.dimension_semantics<parallel>, #tpu.dimension_semantics<parallel>], iteration_bounds = array<i64: 1, 2>, scalar_prefetch = 0 : i64, scratch_operands = 0 : i64, tpu.core_type = #tpu.core_type<tc>, window_params = [{transform_indices = @transform_0, window_bounds = array<i64: 1, 8, 256>}, {transform_indices = @transform_1, window_bounds = array<i64: 1, 8, 256>}, {transform_indices = @transform_2, window_bounds = array<i64: 1, 8, 256>}, {transform_indices = @transform_3, window_bounds = array<i64: 1, 8, 256>}]} {
    %c0 = arith.constant 0 : index
    %c0_0 = arith.constant 0 : index
    %c0_1 = arith.constant 0 : index
    %0 = vector.load %arg2[%c0, %c0_0, %c0_1] : memref<1x8x256xf32, #tpu.memory_space<vmem>>, vector<1x8x256xf32>
    %c0_2 = arith.constant 0 : index
    %c0_3 = arith.constant 0 : index
    %c0_4 = arith.constant 0 : index
    %1 = vector.load %arg3[%c0_2, %c0_3, %c0_4] : memref<1x8x256xf32, #tpu.memory_space<vmem>>, vector<1x8x256xf32>
    %c0_5 = arith.constant 0 : index
    %c0_6 = arith.constant 0 : index
    %c0_7 = arith.constant 0 : index
    %2 = vector.load %arg4[%c0_5, %c0_6, %c0_7] : memref<1x8x256xf32, #tpu.memory_space<vmem>>, vector<1x8x256xf32>
    %c255_i32 = arith.constant 255 : i32
    %3 = tpu.dynamic_rotate %0 by %c255_i32 dim 2 : vector<1x8x256xf32>, i32 -> vector<1x8x256xf32>
    %c1_i32 = arith.constant 1 : i32
    %4 = tpu.dynamic_rotate %0 by %c1_i32 dim 2 : vector<1x8x256xf32>, i32 -> vector<1x8x256xf32>
    %5 = tpu.iota {dimensions = array<i32: 2>} : vector<1x8x256xi32>
    %c2_i32 = arith.constant 2 : i32
    %c0_i32 = arith.constant 0 : i32
    %6 = arith.cmpi eq, %c2_i32, %c0_i32 : i32
    %c1_i32_8 = arith.constant 1 : i32
    %7 = arith.select %6, %c1_i32_8, %c2_i32 : i32
    %8 = vector.broadcast %7 : i32 to vector<1x8x256xi32>
    %9 = arith.remsi %5, %8 : vector<1x8x256xi32>
    %c0_i32_9 = arith.constant 0 : i32
    %10 = vector.broadcast %c0_i32_9 : i32 to vector<1x8x256xi32>
    %11 = arith.cmpi ne, %9, %10 : vector<1x8x256xi32>
    %c0_i32_10 = arith.constant 0 : i32
    %12 = vector.broadcast %c0_i32_10 : i32 to vector<1x8x256xi32>
    %13 = arith.cmpi slt, %9, %12 : vector<1x8x256xi32>
    %c0_i32_11 = arith.constant 0 : i32
    %14 = arith.cmpi slt, %7, %c0_i32_11 : i32
    %15 = vector.broadcast %14 : i1 to vector<1x8x256xi1>
    %16 = vector.broadcast %15 : vector<1x8x256xi1> to vector<1x8x256xi1>
    %17 = arith.xori %13, %16 : vector<1x8x256xi1>
    %18 = arith.andi %17, %11 : vector<1x8x256xi1>
    %19 = vector.broadcast %7 : i32 to vector<1x8x256xi32>
    %20 = arith.addi %9, %19 : vector<1x8x256xi32>
    %21 = arith.select %18, %20, %9 : vector<1x8x256xi1>, vector<1x8x256xi32>
    %c0_i32_12 = arith.constant 0 : i32
    %22 = vector.broadcast %c0_i32_12 : i32 to vector<1x8x256xi32>
    %23 = arith.cmpi eq, %21, %22 : vector<1x8x256xi32>
    %24 = arith.select %23, %3, %4 : vector<1x8x256xi1>, vector<1x8x256xf32>
    %25 = arith.mulf %0, %1 : vector<1x8x256xf32>
    %26 = arith.mulf %24, %2 : vector<1x8x256xf32>
    %27 = arith.addf %25, %26 : vector<1x8x256xf32>
    %c0_13 = arith.constant 0 : index
    %c0_14 = arith.constant 0 : index
    %c0_15 = arith.constant 0 : index
    %28 = vector.load %arg5[%c0_13, %c0_14, %c0_15] : memref<1x8x256xf32, #tpu.memory_space<vmem>>, vector<1x8x256xf32>
    tpu.vector_store %arg5[%c0_13, %c0_14, %c0_15], %27 {strides = array<i32>} : memref<1x8x256xf32, #tpu.memory_space<vmem>>, vector<1x8x256xf32>,
    return
  }
  func.func @transform_0(%arg0: i32, %arg1: i32) -> (i32, i32, i32) {
    %c0_i32 = arith.constant 0 : i32
    %c0_i32_0 = arith.constant 0 : i32
    return %arg1, %arg0, %c0_i32 : i32, i32, i32
  }
  func.func @transform_1(%arg0: i32, %arg1: i32) -> (i32, i32, i32) {
    %c0_i32 = arith.constant 0 : i32
    %c0_i32_0 = arith.constant 0 : i32
    %c0_i32_1 = arith.constant 0 : i32
    return %c0_i32, %arg0, %c0_i32_0 : i32, i32, i32
  }
  func.func @transform_2(%arg0: i32, %arg1: i32) -> (i32, i32, i32) {
    %c0_i32 = arith.constant 0 : i32
    %c0_i32_0 = arith.constant 0 : i32
    %c0_i32_1 = arith.constant 0 : i32
    return %c0_i32, %arg0, %c0_i32_0 : i32, i32, i32
  }
  func.func @transform_3(%arg0: i32, %arg1: i32) -> (i32, i32, i32) {
    %c0_i32 = arith.constant 0 : i32
    %c0_i32_0 = arith.constant 0 : i32
    return %arg1, %arg0, %c0_i32 : i32, i32, i32
  }
}

</mosaic_0001>

<bundles_post_ra>
// kernel: rotary_positional_embedding.1
= control target key start
LH: loop header
LB: loop body
LE: loop exit
PB: predicated region body
PF: predicated region fallthrough
CT: control target
= control target key end

     0   :  { %s516_s12 = smov 0   ;;  %s518_s13 = smov 0   ;;  %s568_s0 = inlined_call_operand.vmem [shape: f32[2,8,256], index: 0, kind: input, shape index: {}]   ;;  %s569_s1 = inlined_call_operand.vmem [shape: f32[1,8,256], index: 1, kind: input, shape index: {}]   ;;  %s570_s2 = inlined_call_operand.vmem [shape: f32[1,8,256], index: 2, kind: input, shape index: {}]   ;;  %s571_s3 = inlined_call_operand.vmem [shape: f32[2,8,256], index: 3, kind: output, shape index: {}]  }
   0x1   :  { %s520_s14 = smov 0  }
   0x2 LB: > { %s22_s15 = sadd.s32 1, %s488_s13  ;;  %p435_p0 = scmp.ge.s32.totalorder %s492_s14, 1  ;;  %s492_s14 = sphi %s520_s14, %s13_s14   ;;  %s488_s13 = sphi %s518_s13, %s573_s13   ;;  %s484_s12 = sphi %s516_s12, %s572_s12  }
   0x3   : > { %p23_p1 = scmp.ge.s32.totalorder %s22_s15, 2  ;;  %p177_p2 = scmp.lt.s32.totalorder %s492_s14, 3 }
   0x5   : > { %s575_s15 = smov (%p23_p1, %s22_s15), 0  ;;  %p178_p3 = pnand %p435_p0, %p177_p2 }
   0x6   : > { %p219_p4 = scmp.lt.s32.totalorder (!%p178_p3), %s484_s12, 1  ;;  %s494_s20 = smov (!%p178_p3), 1  }
   0x7   : > { %181 = sbr.rel (%p178_p3) target bundleno = 142 (0x8e), region = 32  ;;  %s495_s21 = smov (!%p178_p3), 127  }
   0xc   : > { %s577_s12 = smov (!%p219_p4, %s484_s12), 1  ;;  %v257_v2 = vlaneseq  ;;  %v249_v9 = vld [vmem:[%s569_s1] sm:$0xff]  ;;  %v250_v10 = vld [vmem:[%s569_s1 + $0x8] sm:$0xff] }
   0xd   : > { %s442_s16 = sshll.u32 %s577_s12, 4  ;;  %v251_v14 = vld [vmem:[%s570_s2] sm:$0xff]  ;;  %v252_v15 = vld [vmem:[%s570_s2 + $0x8] sm:$0xff] }
   0xe   : > { %s227_s19 = scalar_lea.vmem %s568_s0, %s442_s16  ;;  %v258_v3 = vand.u32 127, %v257_v2  ;;  %s246_s5 = scalar_lea.vmem %s571_s3, %s442_s16 }
   0xf   : > { %v247_v0 = vld [vmem:[%s227_s19] sm:$0xff]  ;;  %v248_v1 = vld [vmem:[%s227_s19 + $0x8] sm:$0xff] }
  0x10   : > { %262 = vrot.lane.b32.xlu1 %v247_v0, %s494_s20  ;;  %253 = vrot.lane.b32.xlu0 %v247_v0, %s495_s21  ;;  %v269_v4 = vadd.s32 128, %v258_v3  ;;  %v274_v5 = vand.u32 1, %v258_v3  ;;  %vm266_vm0 = vcmp.lt.s32.totalorder %v258_v3, 1  ;;  %vm259_vm1 = vcmp.lt.s32.totalorder %v258_v3, 127 }
  0x11   : > { %v298_v11 = vmul.f32 %v249_v9, %v247_v0  ;;  %v299_v12 = vmul.f32 %v250_v10, %v248_v1 }
  0x12   : > { %v281_v6 = vand.u32 1, %v269_v4  ;;  %vm294_vm2 = vcmp.eq.s32.totalorder %v274_v5, 0 }
  0x14   : > { %264 = vrot.lane.b32.xlu1 %v248_v1, %s494_s20  ;;  %255 = vrot.lane.b32.xlu0 %v248_v1, %s495_s21  ;;  %vm295_vm3 = vcmp.eq.s32.totalorder %v281_v6, 0 }
  0x82   : > { %v263_v7 = vpop.permute.xlu1 %262  ;;  %v254_v8 = vpop.permute.xlu0 %253 }
  0x86   : > { %v265_v13 = vpop.permute.xlu1 %264  ;;  %v256_v16 = vpop.permute.xlu0 %255 }
  0x87   : > { %v267_v17 = vsel %vm266_vm0, %v263_v7, %v265_v13  ;;  %v268_v18 = vsel %vm266_vm0, %v265_v13, %v263_v7  ;;  %v260_v19 = vsel %vm259_vm1, %v254_v8, %v256_v16  ;;  %v261_v20 = vsel %vm259_vm1, %v256_v16, %v254_v8 }
  0x88   : > { %v296_v21 = vsel %vm294_vm2, %v260_v19, %v268_v18  ;;  %v297_v22 = vsel %vm295_vm3, %v261_v20, %v267_v17 }
  0x89   : > { %v300_v23 = vmul.f32 %v296_v21, %v251_v14  ;;  %v301_v24 = vmul.f32 %v297_v22, %v252_v15 }
  0x8b   : > { %v302_v25 = vadd.f32 %v300_v23, %v298_v11  ;;  %v303_v26 = vadd.f32 %v301_v24, %v299_v12 }
  0x8d   : > { %304 = vst [vmem:[%s246_s5] sm:$0xff] %v302_v25  ;;  %305 = vst [vmem:[%s246_s5 + $0x8] sm:$0xff] %v303_v26 }
  0x8e PF: > { %s13_s14 = sadd.s32 1, %s492_s14   ;;  %s572_s12 = smov %s488_s13 }
  0x8f   : > { %p10_p5 = scmp.ge.s32.totalorder %s13_s14, 4   ;;  %s573_s13 = smov %s575_s15 }
  0x91   :  { %12 = sbr.rel (!%p10_p5) target bundleno = 2 (0x2), region = 68 }

</bundles_post_ra>
